<compile_context>
chip_gen: v7x
topology: tpu7x:2x2x1
jax: 0.10.0
libtpu: 0.0.40
codegen_flags: <defaults>
</compile_context>

<pallas_src>
import jax
import jax.numpy as jnp
from jax import lax
from jax.experimental import pallas as pl
from jax.experimental.pallas import tpu as pltpu


def _residual_linear_kernel(x_lhs_ref, wt_ref, b_ref, x_res_ref, o_ref):
    # x_lhs_ref: (tm, tk) bf16  matmul lhs tile of x               index (i, k)
    # wt_ref:    (tk, tn) bf16  pre-transposed weight tile [K, N]  index (k, j)
    # b_ref:     (1,  tn) f32   bias tile                          index (0, j)
    # x_res_ref: (tm, tn) f32   residual tile of x                 index (i, j)
    # o_ref:     (tm, tn) f32   output tile == f32 accumulator     index (i, j)
    k = pl.program_id(2)

    @pl.when(k == 0)
    def _():
        # Fold bias + residual into the accumulator init: removes the zero-fill
        # pass and the epilogue read-add-add-write of the old version.
        o_ref[...] = x_res_ref[...] + b_ref[...]

    # Canonical NN matmul on the MXU: bf16 operands, f32 accumulation,
    # accumulated directly into the resident f32 output block.
    o_ref[...] += jnp.dot(
        x_lhs_ref[...], wt_ref[...], preferred_element_type=jnp.float32
    )


def _pick_tile(dim, target, aligns):
    """Largest divisor of `dim` that is <= target and a multiple of one of
    `aligns` (tried in preference order); falls back to the full dimension."""
    if dim <= target:
        return dim
    for align in aligns:
        t = (target // align) * align
        while t >= align:
            if dim % t == 0:
                return t
            t -= align
    return dim


def _halve_tile(dim, tile, align):
    """Halve `tile` keeping alignment + divisibility, else return it unchanged."""
    half = tile // 2
    if half >= align and half % align == 0 and dim % half == 0:
        return half
    return tile


def _vmem_budget_bytes():
    """Generation-aware VMEM budget (~70% of physical; v7x has 64 MiB/TC)."""
    try:
        cap = pltpu.get_tpu_info().vmem_capacity_bytes
    except Exception:
        cap = 64 * 1024 * 1024  # conservative (v7x per-TC) fallback
    return max(int(0.7 * cap), 32 * 1024 * 1024)


def residual_wrapper_forward(x, w, b, *,
                             tm_target=512, tn_target=1024, tk_target=512):
    """out = x + (x @ w.T + b), fused in a tiled Pallas kernel.

    x: [B, H] float32
    w: [H, H] float32, PyTorch Linear layout [out_features, in_features]
    b: [H]    float32

    Note: the matmul runs with bf16 operands / f32 accumulation (MXU-native),
    which deviates from a strict f32 nn.Linear by ~3 decimal digits; the
    bias and residual adds stay f32.
    """
    B, K = x.shape
    N, K2 = w.shape
    assert K == K2 and b.shape == (N,)
    assert N == K, "residual wrapper requires in_features == out_features"
    assert x.dtype == jnp.float32, "kernel accumulates directly in the f32 output"

    # Tile selection: prefer 256-aligned tn/tk (v6e/v7x 2x256^2 MXU) and
    # 16-aligned tm (bf16 sublane pack), fall back to 128/8.
    tm = _pick_tile(B, tm_target, aligns=(16, 8))
    tn = _pick_tile(N, tn_target, aligns=(256, 128))
    tk = _pick_tile(K, tk_target, aligns=(256, 128))

    # v7x: the two TensorCores shard the "parallel" grid axes; make sure the
    # (M, N) parallel grid has at least 2 blocks when shapes allow.
    if (B // tm) * (N // tn) < 2:
        new_tn = _halve_tile(N, tn, 128)
        if new_tn != tn:
            tn = new_tn
        else:
            tm = _halve_tile(B, tm, 8)

    grid = (B // tm, N // tn, K // tk)

    # Explicit VMEM footprint guard (double-buffered inputs + resident output)
    # instead of silently blowing past the limit when a dim has no nice divisor.
    vmem_limit = _vmem_budget_bytes()
    per_buf = (tm * tk * 2      # x lhs (bf16)
               + tk * tn * 2    # W^T   (bf16)
               + tn * 4         # bias  (f32)
               + tm * tn * 4)   # residual (f32)
    footprint = 2 * per_buf + 2 * tm * tn * 4  # + double-buffered f32 output
    if footprint > vmem_limit:
        raise ValueError(
            f"tile ({tm},{tn},{tk}) needs ~{footprint >> 20} MiB VMEM, "
            f"budget is {vmem_limit >> 20} MiB; shrink tile targets")

    # One-time host-side prep: bf16 matmul operands, [K, N] weight layout.
    x_lhs = x.astype(jnp.bfloat16)
    wt = jnp.transpose(w).astype(jnp.bfloat16)   # [K, N]
    b2 = b.reshape(1, N).astype(jnp.float32)

    # Cost hint including operand re-streaming (x lhs read N/tn times,
    # W read B/tm times).
    n_i, n_j, _ = grid
    cost = pl.CostEstimate(
        flops=2 * B * N * K,
        transcendentals=0,
        bytes_accessed=(2 * B * K * n_j      # bf16 x lhs, re-streamed per j
                        + 2 * K * N * n_i    # bf16 W^T,  re-streamed per i
                        + 4 * N              # bias
                        + 4 * B * N          # f32 residual read
                        + 4 * B * N),        # f32 output write
    )

    return pl.pallas_call(
        _residual_linear_kernel,
        out_shape=jax.ShapeDtypeStruct((B, N), jnp.float32),
        grid_spec=pltpu.PrefetchScalarGridSpec(
            num_scalar_prefetch=0,
            grid=grid,
            in_specs=[
                pl.BlockSpec((tm, tk), lambda i, j, k: (i, k)),  # x lhs (bf16)
                pl.BlockSpec((tk, tn), lambda i, j, k: (k, j)),  # W^T   (bf16)
                pl.BlockSpec((1, tn), lambda i, j, k: (0, j)),   # bias  (f32)
                pl.BlockSpec((tm, tn), lambda i, j, k: (i, j)),  # residual (f32)
            ],
            out_specs=pl.BlockSpec((tm, tn), lambda i, j, k: (i, j)),
        ),
        compiler_params=pltpu.CompilerParams(
            # M/N parallel (megacore / v7x 2-TC), K is the reduction axis.
            dimension_semantics=("parallel", "parallel", "arbitrary"),
            vmem_limit_bytes=vmem_limit,
        ),
        cost_estimate=cost,
    )(x_lhs, wt, b2, x)


if __name__ == "__main__":
    B, H = 8, 512  # small demo shapes; H a multiple of 256 keeps MXU passes full

    key = jax.random.PRNGKey(0)
    kx, kw, kb = jax.random.split(key, 3)

    x = jax.random.normal(kx, (B, H), dtype=jnp.float32)
    # Deterministic synthetic params for the inner nn.Linear(H, H).
    w = jax.random.normal(kw, (H, H), dtype=jnp.float32) * 0.02
    b = jax.random.normal(kb, (H,), dtype=jnp.float32) * 0.01

    # Smaller tile targets so the demo exercises the full tiled (M, N, K) grid
    # with k-accumulation: grid = (1, 2, 2), tn = tk = 256.
    out = residual_wrapper_forward(x, w, b, tn_target=256, tk_target=256)
    jax.block_until_ready(out)

    # Pure-JAX reference with matching bf16 operands / f32 accumulation.
    y_ref = lax.dot_general(
        x.astype(jnp.bfloat16), w.astype(jnp.bfloat16),
        dimension_numbers=(((1,), (1,)), ((), ())),
        preferred_element_type=jnp.float32,
    )
    ref = x + (y_ref + b)
    assert jnp.allclose(out, ref, atol=2e-3, rtol=2e-3), "mismatch vs reference"

    print("KERNEL_OK")
</pallas_src>

<mosaic_0001>
module attributes {stable_mosaic.version = 11 : i64} {
  func.func @_residual_linear_kernel(%arg0: i32, %arg1: i32, %arg2: i32, %arg3: memref<8x256xbf16, #tpu.memory_space<vmem>>, %arg4: memref<256x256xbf16, #tpu.memory_space<vmem>>, %arg5: memref<1x256xf32, #tpu.memory_space<vmem>>, %arg6: memref<8x256xf32, #tpu.memory_space<vmem>>, %arg7: memref<8x256xf32, #tpu.memory_space<vmem>>) attributes {dimension_semantics = [#tpu.dimension_semantics<parallel>, #tpu.dimension_semantics<parallel>, #tpu.dimension_semantics<arbitrary>], iteration_bounds = array<i64: 1, 2, 2>, scalar_prefetch = 0 : i64, scratch_operands = 0 : i64, tpu.core_type = #tpu.core_type<tc>, window_params = [{transform_indices = @transform_0, window_bounds = array<i64: 8, 256>}, {transform_indices = @transform_1, window_bounds = array<i64: 256, 256>}, {transform_indices = @transform_2, window_bounds = array<i64: 1, 256>}, {transform_indices = @transform_3, window_bounds = array<i64: 8, 256>}, {transform_indices = @transform_4, window_bounds = array<i64: 8, 256>}]} {
    %c0_i32 = arith.constant 0 : i32
    %0 = arith.cmpi eq, %arg2, %c0_i32 : i32
    %1 = arith.extui %0 : i1 to i32
    %c0_i32_0 = arith.constant 0 : i32
    %2 = arith.cmpi ne, %1, %c0_i32_0 : i32
    scf.if %2 {
      %c0_8 = arith.constant 0 : index
      %c0_9 = arith.constant 0 : index
      %9 = vector.load %arg6[%c0_8, %c0_9] : memref<8x256xf32, #tpu.memory_space<vmem>>, vector<8x256xf32>
      %c0_10 = arith.constant 0 : index
      %c0_11 = arith.constant 0 : index
      %10 = vector.load %arg5[%c0_10, %c0_11] : memref<1x256xf32, #tpu.memory_space<vmem>>, vector<1x256xf32>
      %11 = vector.broadcast %10 : vector<1x256xf32> to vector<8x256xf32>
      %12 = arith.addf %9, %11 : vector<8x256xf32>
      %c0_12 = arith.constant 0 : index
      %c0_13 = arith.constant 0 : index
      %13 = vector.load %arg7[%c0_12, %c0_13] : memref<8x256xf32, #tpu.memory_space<vmem>>, vector<8x256xf32>
      tpu.vector_store %arg7[%c0_12, %c0_13], %12 {strides = array<i32>} : memref<8x256xf32, #tpu.memory_space<vmem>>, vector<8x256xf32>,
    } else {
    }
    %c0 = arith.constant 0 : index
    %c0_1 = arith.constant 0 : index
    %3 = vector.load %arg7[%c0, %c0_1] : memref<8x256xf32, #tpu.memory_space<vmem>>, vector<8x256xf32>
    %c0_2 = arith.constant 0 : index
    %c0_3 = arith.constant 0 : index
    %4 = vector.load %arg3[%c0_2, %c0_3] : memref<8x256xbf16, #tpu.memory_space<vmem>>, vector<8x256xbf16>
    %c0_4 = arith.constant 0 : index
    %c0_5 = arith.constant 0 : index
    %5 = vector.load %arg4[%c0_4, %c0_5] : memref<256x256xbf16, #tpu.memory_space<vmem>>, vector<256x256xbf16>
    %cst = arith.constant dense<0.000000e+00> : vector<8x256xf32>
    %6 = tpu.matmul %4, %5, %cst {dimension_numbers = #tpu.dot_dimension_numbers<[1], [0], [0], [1], [0, 0, 1, 1], [], []>} : vector<8x256xbf16>, vector<256x256xbf16>, vector<8x256xf32> -> vector<8x256xf32>
    %7 = arith.addf %3, %6 : vector<8x256xf32>
    %c0_6 = arith.constant 0 : index
    %c0_7 = arith.constant 0 : index
    %8 = vector.load %arg7[%c0_6, %c0_7] : memref<8x256xf32, #tpu.memory_space<vmem>>, vector<8x256xf32>
    tpu.vector_store %arg7[%c0_6, %c0_7], %7 {strides = array<i32>} : memref<8x256xf32, #tpu.memory_space<vmem>>, vector<8x256xf32>,
    return
  }
  func.func @transform_0(%arg0: i32, %arg1: i32, %arg2: i32) -> (i32, i32) {
    %c0_i32 = arith.constant 0 : i32
    return %arg0, %arg2 : i32, i32
  }
  func.func @transform_1(%arg0: i32, %arg1: i32, %arg2: i32) -> (i32, i32) {
    %c0_i32 = arith.constant 0 : i32
    return %arg2, %arg1 : i32, i32
  }
  func.func @transform_2(%arg0: i32, %arg1: i32, %arg2: i32) -> (i32, i32) {
    %c0_i32 = arith.constant 0 : i32
    %c0_i32_0 = arith.constant 0 : i32
    return %c0_i32, %arg1 : i32, i32
  }
  func.func @transform_3(%arg0: i32, %arg1: i32, %arg2: i32) -> (i32, i32) {
    %c0_i32 = arith.constant 0 : i32
    return %arg0, %arg1 : i32, i32
  }
  func.func @transform_4(%arg0: i32, %arg1: i32, %arg2: i32) -> (i32, i32) {
    %c0_i32 = arith.constant 0 : i32
    return %arg0, %arg1 : i32, i32
  }
}

</mosaic_0001>

<bundles_post_ra>
// kernel: tpu_custom_call.1
= control target key start
LH: loop header
LB: loop body
LE: loop exit
PB: predicated region body
PF: predicated region fallthrough
CT: control target
= control target key end

     0   :  { %s1760_s0 = inlined_call_operand.hbm [shape: bf16[8,512], index: 0, kind: input, shape index: {}]   ;;  %s1761_s1 = inlined_call_operand.hbm [shape: bf16[512,512], index: 1, kind: input, shape index: {}]   ;;  %s1762_s2 = inlined_call_operand.vmem [shape: f32[1,512], index: 2, kind: input, shape index: {}]   ;;  %s1763_s3 = inlined_call_operand.hbm [shape: f32[8,512], index: 3, kind: input, shape index: {}]   ;;  %s1764_s4 = inlined_call_operand.hbm [shape: f32[8,512], index: 4, kind: output, shape index: {}]  }
   0x1   :  { %1777 = sst [smem:[#allocation19_spill]] %s1760_s0 }
   0x2   :  { %1778 = sst [smem:[#allocation20_spill]] %s1761_s1 }
   0x3   :  { %1779 = sst [smem:[#allocation21_spill]] %s1762_s2 }
   0x4   :  { %1780 = sst [smem:[#allocation22_spill]] %s1763_s3 }
   0x5   :  { %1781 = sst [smem:[#allocation23_spill]] %s1764_s4 }
   0x6   :  { %9 = vsyncpa [#allocation3], 0 }
   0x7   :  { %11 = vsyncpa [#allocation3 + $0x1], 0 }
   0x8   :  { %12 = vsyncpa [#allocation6], 0 }
   0x9   :  { %14 = vsyncpa [#allocation6 + $0x1], 0 }
   0xa   :  { %15 = vsyncpa [#allocation4], 0 }
   0xb   :  { %17 = vsyncpa [#allocation4 + $0x1], 0  ;;  %s1313_s15 = smov 0   ;;  %s1315_s16 = smov 0  }
   0xc   :  { %s1317_s17 = smov 0   ;;  %s1319_s18 = smov 0  }
   0xd   :  { %s1321_s19 = smov 0   ;;  %s1323_s20 = smov 0  }
   0xe   :  { %s1325_s21 = smov 0   ;;  %s1327_s22 = smov 0  }
   0xf   :  { %s1329_s23 = smov 0   ;;  %s1331_s24 = smov 0  }
  0x10   :  { %s1333_s25 = smov 0   ;;  %s1335_s26 = smov 0  }
  0x11   :  { %s1337_s27 = smov 0   ;;  %s1339_s28 = smov 0  }
  0x12 LB: > { %1782 = sst [smem:[#allocation13_spill]] %s1227_s15  ;;  %s35_s29 = sadd.s32 1, %s1271_s26  ;;  %s1279_s28 = sphi %s1339_s28, %s23_s28   ;;  %s1275_s27 = sphi %s1337_s27, %s1822_s27   ;;  %s1271_s26 = sphi %s1335_s26, %s1833_s26   ;;  %s1267_s25 = sphi %s1333_s25, %s1820_s25   ;;  %s1263_s24 = sphi %s1331_s24, %s1832_s24   ;;  %s1259_s23 = sphi %s1329_s23, %s1831_s23   ;;  %s1255_s22 = sphi %s1327_s22, %s1830_s22   ;;  %s1251_s21 = sphi %s1325_s21, %s1829_s21   ;;  %s1247_s20 = sphi %s1323_s20, %s1828_s20   ;;  %s1243_s19 = sphi %s1321_s19, %s1827_s19   ;;  %s1239_s18 = sphi %s1319_s18, %s1826_s18   ;;  %s1235_s17 = sphi %s1317_s17, %s1825_s17   ;;  %s1231_s16 = sphi %s1315_s16, %s1824_s16   ;;  %s1227_s15 = sphi %s1313_s15, %s1823_s15  }
  0x13   : > { %1783 = sst [smem:[#allocation14_spill]] %s1263_s24  ;;  %s38_s30 = sadd.s32 1, %s1275_s27 }
  0x14   : > { %1784 = sst [smem:[#allocation15_spill]] %s1267_s25  ;;  %p36_p0 = scmp.ge.s32.totalorder %s35_s29, 2 }
  0x15   : > { %1785 = sst [smem:[#allocation16_spill]] %s1275_s27  ;;  %p1771_p1 = scmp.eq.s32.totalorder %s1279_s28, 0 }
  0x16   : > { %s79_s5 = sadd.s32 1, %s1247_s20  ;;  %p86_p2 = scmp.ne.s32.totalorder %s1247_s20, %s1243_s19 }
  0x17   : > { %s1835_s29 = smov (%p36_p0, %s35_s29), 0  ;;  %s1837_s30 = smov (!%p36_p0, %s38_s30), %s1275_s27 }
  0x18   : > { %1786 = sst [smem:[#allocation17_spill]] %s1835_s29  ;;  %s1394_s6 = ssub.s32 %s1271_s26, %s1835_s29 }
  0x19   : > { %p1398_p3 = por %p86_p2, %p1771_p1  ;;  %p40_p4 = scmp.ge.s32.totalorder %s1837_s30, 2 }
  0x1a   : > { %p1769_p6 = scmp.lt.s32.totalorder %s1279_s28, 4  ;;  %s842_s8 = sshll.u32 %s1271_s26, 7 }
  0x1b   : > { %s1839_s30 = smov (%p40_p4, %s1837_s30), 0  ;;  %s219_s9 = sand.u32 1, %s1279_s28  }
  0x1c   : > { %1788 = sst [smem:[#allocation18_spill]] %s1839_s30  ;;  %s1411_s10 = ssub.s32 %s1275_s27, %s1839_s30 }
  0x1d   : > { %s76_s11 = sor.u32 %s1411_s10, %s1394_s6  ;;  %s221_s12 = sand.u32 1, %s1247_s20  }
  0x1e   : > { %p77_p7 = scmp.eq.s32.totalorder %s76_s11, 0  ;;  %s788_s13 = sshll.u32 %s221_s12, 8 }
  0x1f   : > { %s790_s14 = sshll.u32 %s1275_s27, 1  ;;  %s223_s24 = scalar_lea.vmem [#allocation5], %s788_s13 }
  0x20   : > { %s1418_s29 = scalar_select %p77_p7, %s1247_s20, %s79_s5  }
  0x21   : > { %s230_s4 = sadd.s32 %s842_s8, %s790_s14  ;;  %s233_s2 = sshll.u32 %s223_s24, 4  ;;  %s1422_s2 = int_to_ptr.vmem [resolvable:$true] %s233_s2 }
  0x22   : > { %s792_s25 = sshll.u32 %s230_s4, 6  ;;  %s1789_s1 = sld [smem:[#allocation20_spill]] }
  0x23   : > { %p1433_p8 = pnand %p1769_p6, %p1398_p3  ;;  %s1437_s4 = scalar_lea.sflag [#allocation6], %s219_s9 }
  0x25   : > { %p1037_p10 = pneg %p1433_p8 }
  0x28   : > { %s1427_s30 = scalar_lea.hbm %s1789_s1, %s792_s25  ;;  %s1040_s25 = scalar_lea.hbm %s1789_s1, 16384 }
  0x29   : > { %s1035_s24 = scalar_lea.hbm %s1427_s30, 4096  ;;  %p1041_p13 = scmp.lt.u32.totalorder %s1427_s30, %s1789_s1 }
  0x2a   : > { %p1036_p9 = scmp.ne.s32.totalorder %s1427_s30, %s1035_s24  ;;  %p1042_p0 = scmp.lt.u32.totalorder %s1040_s25, %s1035_s24 }
  0x2b   : > { %p1044_p3 = scmp.lt.u32.totalorder %s1035_s24, %s1427_s30 }
  0x2c   : > { %p1038_p11 = pnand %p1037_p10, %p1036_p9  ;;  %p1043_p2 = por %p1042_p0, %p1041_p13 }
  0x2e   : > { %p1039_p12 = pneg %p1038_p11  ;;  %p1045_p4 = por %p1044_p3, %p1043_p2 }
  0x30   : > { %p1046_p7 = pnand %p1045_p4, %p1039_p12 }
  0x32   : > { %1049 = shalt.err (!%p1046_p7)
}
  0x33   : > { %s1050_s9 = scalar_lea.vmem %s1422_s2, 4096  ;;  %s1281_s12 = smov [#allocation5]  }
  0x34   : > { %p1051_p9 = scmp.ne.s32.totalorder %s1422_s2, %s1050_s9  ;;  %s1055_s13 = sshll.u32 %s1281_s12, 4  ;;  %s1056_s13 = int_to_ptr.vmem [resolvable:$false] %s1055_s13 }
  0x35   : > { %s1057_s14 = scalar_lea.vmem %s1056_s13, 8192  ;;  %p1058_p5 = scmp.lt.s32.totalorder %s1422_s2, %s1056_s13 }
  0x36   : > { %p1053_p11 = pnand %p1051_p9, %p1037_p10  ;;  %p1059_p13 = scmp.lt.s32.totalorder %s1057_s14, %s1050_s9 }
  0x38   : > { %p1054_p6 = pneg %p1053_p11  ;;  %p1060_p0 = por %p1059_p13, %p1058_p5 }
  0x3a   : > { %p1061_p2 = pnand %p1060_p0, %p1054_p6 }
  0x3c   : > { %1064 = shalt.err (!%p1061_p2)
}
  0x3d   : > { %s1282_s24 = smov 256   ;;  %s1283_s3 = smov 128  }
  0x3e   : > { %s1284_s15 = smov 8   ;;  %p796_p5 = scmp.ge.s32.totalorder %s1279_s28, 1 }
  0x3f   : > { %860 = dma.hbm_to_vmem [thread:$0]  (!%p1433_p8), %s1427_s30, 4096, %s1422_s2, %s1437_s4, %s1282_s24, %s1283_s3, %s1284_s15  }
  0x40   : > { %p270_p6 = scmp.lt.s32.totalorder %s1279_s28, 5  ;;  %s1472_s7 = sadd.s32 4294967295, %s1279_s28  }
  0x41   : > { %p49_p12 = scmp.eq.s32.totalorder %s1394_s6, 0  ;;  %s51_s11 = sadd.s32 1, %s1259_s23 }
  0x42   : > { %p1467_p10 = pnand %p796_p5, %p270_p6  ;;  %p58_p3 = scmp.ne.s32.totalorder %s1259_s23, %s1255_s22 }
  0x43   : > { %p64_p4 = scmp.ne.s32.totalorder %s1255_s22, %s1251_s21  ;;  %p1770_p7 = scmp.eq.s32.totalorder %s1472_s7, 0 }
  0x44   : > { %s1791_s25 = scalar_select %p1467_p10, 1, 0 }
  0x45   : > { %s1481_s5 = scalar_select %p49_p12, %s1259_s23, %s51_s11  }
  0x46   : > { %p60_p8 = por %p1771_p1, %p58_p3  ;;  %s198_s2 = sand.u32 1, %s1259_s23  }
  0x47   : > { %s1792_s0 = sld [smem:[#allocation19_spill]]  ;;  %p1496_p9 = por %p1770_p7, %p64_p4 }
  0x48   : > { %p1794_p11 = scmp.ne.s32.totalorder %s1243_s19, %s1239_s18  ;;  %s785_s13 = sshll.u32 %s198_s2, 3 }
  0x49   : > { %s1793_s6 = scalar_select %p1496_p9, 1, 0 }
  0x4a   : > { %p1505_p13 = por %p1794_p11, %p1770_p7  ;;  %p1796_p0 = scmp.lt.s32.totalorder %s1279_s28, 4 }
  0x4b   : > { %s202_s14 = scalar_lea.vmem [#allocation2], %s785_s13  ;;  %s199_s3 = scalar_lea.sflag [#allocation3], %s198_s2 }
  0x4c   : > { %s1795_s21 = scalar_select %p1505_p13, 1, 0 }
  0x4d   : > { %s1492_s12 = scalar_lea.hbm %s1792_s0, %s842_s8  ;;  %p1511_p2 = pnand %p1796_p0, %p60_p8 }
  0x4e   : > { %s212_s24 = sshll.u32 %s202_s14, 4  ;;  %s1065_s15 = scalar_lea.hbm %s1492_s12, 128  ;;  %s1515_s24 = int_to_ptr.vmem [resolvable:$true] %s212_s24 }
  0x4f   : > { %p1066_p5 = scmp.ne.s32.totalorder %s1492_s12, %s1065_s15  ;;  %p1067_p6 = pneg %p1511_p2 }
  0x50   : > { %s1070_s30 = scalar_lea.hbm %s1792_s0, 256  ;;  %p1071_p4 = scmp.lt.u32.totalorder %s1492_s12, %s1792_s0 }
  0x51   : > { %p1068_p12 = pnand %p1067_p6, %p1066_p5  ;;  %p1072_p8 = scmp.lt.u32.totalorder %s1070_s30, %s1065_s15 }
  0x52   : > { %p1074_p0 = scmp.lt.u32.totalorder %s1065_s15, %s1492_s12 }
  0x53   : > { %p1069_p3 = pneg %p1068_p12  ;;  %p1073_p11 = por %p1072_p8, %p1071_p4 }
  0x55   : > { %p1075_p7 = por %p1074_p0, %p1073_p11 }
  0x57   : > { %p1076_p1 = pnand %p1075_p7, %p1069_p3 }
  0x59   : > { %1079 = shalt.err (!%p1076_p1)
}
  0x5a   : > { %s1080_s2 = scalar_lea.vmem %s1515_s24, 128  ;;  %s1285_s13 = smov [#allocation2]  }
  0x5b   : > { %p1081_p5 = scmp.ne.s32.totalorder %s1515_s24, %s1080_s2  ;;  %s1085_s14 = sshll.u32 %s1285_s13, 4  ;;  %s1086_s14 = int_to_ptr.vmem [resolvable:$false] %s1085_s14 }
  0x5c   : > { %s1087_s1 = scalar_lea.vmem %s1086_s14, 256  ;;  %p1088_p9 = scmp.lt.s32.totalorder %s1515_s24, %s1086_s14 }
  0x5d   : > { %p1083_p12 = pnand %p1081_p5, %p1067_p6  ;;  %p1089_p4 = scmp.lt.s32.totalorder %s1087_s1, %s1080_s2 }
  0x5f   : > { %p1084_p13 = pneg %p1083_p12  ;;  %p1090_p8 = por %p1089_p4, %p1088_p9 }
  0x61   : > { %p1091_p11 = pnand %p1090_p8, %p1084_p13 }
  0x63   : > { %1094 = shalt.err (!%p1091_p11)
}
  0x64   : > { %s1798_s15 = sld [smem:[#allocation13_spill]]  ;;  %s782_s18 = sadd.s32 4294967294, %s1279_s28  }
  0x65   : > { %857 = dma.hbm_to_vmem [thread:$0]  (!%p1511_p2), %s1492_s12, 128, %s1515_s24, %s199_s3  }
  0x66   : > { %p131_p1 = scmp.eq.s32.totalorder %s1411_s10, 0  ;;  %s133_s8 = sadd.s32 1, %s1235_s17 }
  0x67   : > { %p140_p7 = scmp.ne.s32.totalorder %s1235_s17, %s1231_s16  ;;  %p1799_p13 = scmp.eq.s32.totalorder %s1279_s28, 0 }
  0x68   : > { %s1550_s11 = scalar_select %p131_p1, %s1235_s17, %s133_s8  }
  0x69   : > { %p142_p6 = por %p140_p7, %p1799_p13  ;;  %p1800_p3 = scmp.eq.s32.totalorder %s1472_s7, 0 }
  0x6a   : > { %p146_p9 = scmp.ne.s32.totalorder %s1231_s16, %s1798_s15  ;;  %p172_p5 = scmp.eq.s32.totalorder %s1472_s7, 3 }
  0x6b   : > { %p178_p12 = scmp.eq.s32.totalorder %s782_s18, 3  ;;  %s253_s9 = sand.u32 1, %s1235_s17  }
  0x6c   : > { %p1556_p0 = por %p146_p9, %p1800_p3  ;;  %s844_s2 = sshll.u32 %s1275_s27, 8 }
  0x6d   : > { %p1563_p2 = por %p172_p5, %p140_p7  ;;  %p1567_p4 = por %p178_p12, %p146_p9 }
  0x6e   : > { %s1801_s30 = scalar_select %p1556_p0, 1, 0 }
  0x6f   : > { %s1802_s12 = scalar_select %p1563_p2, 1, 0 }
  0x70   : > { %s1803_s10 = scalar_select %p1567_p4, 1, 0 }
  0x71   : > { %s793_s24 = sshll.u32 %s253_s9, 4  ;;  %s1804_s14 = sld [smem:[#allocation22_spill]] }
  0x72   : > { %p1805_p8 = scmp.lt.s32.totalorder %s1279_s28, 4  ;;  %s255_s18 = scalar_lea.vmem [#allocation7], %s793_s24 }
  0x73   : > { %s265_s8 = sshll.u32 %s255_s18, 4  ;;  %s266_s8 = int_to_ptr.vmem [resolvable:$true] %s265_s8 }
  0x74   : > { %p1578_p11 = pnand %p1805_p8, %p142_p6 }
  0x76   : > { %p1097_p7 = pneg %p1578_p11 }
  0x77   : > { %s1574_s1 = scalar_lea.hbm %s1804_s14, %s844_s2  ;;  %s1100_s13 = scalar_lea.hbm %s1804_s14, 512 }
  0x78   : > { %s1095_s9 = scalar_lea.hbm %s1574_s1, 256  ;;  %p1101_p6 = scmp.lt.u32.totalorder %s1574_s1, %s1804_s14 }
  0x79   : > { %p1096_p1 = scmp.ne.s32.totalorder %s1574_s1, %s1095_s9  ;;  %p1102_p3 = scmp.lt.u32.totalorder %s1100_s13, %s1095_s9 }
  0x7a   : > { %p1104_p12 = scmp.lt.u32.totalorder %s1095_s9, %s1574_s1 }
  0x7b   : > { %p1098_p9 = pnand %p1097_p7, %p1096_p1  ;;  %p1103_p5 = por %p1102_p3, %p1101_p6 }
  0x7d   : > { %p1099_p13 = pneg %p1098_p9  ;;  %p1105_p8 = por %p1104_p12, %p1103_p5 }
  0x7f   : > { %p1106_p4 = pnand %p1105_p8, %p1099_p13 }
  0x81   : > { %1109 = shalt.err (!%p1106_p4)
}
  0x82   : > { %s1110_s24 = scalar_lea.vmem %s266_s8, 256  ;;  %s1286_s18 = smov [#allocation7]  }
  0x83   : > { %p1111_p2 = scmp.ne.s32.totalorder %s266_s8, %s1110_s24  ;;  %s1115_s2 = sshll.u32 %s1286_s18, 4  ;;  %s1116_s2 = int_to_ptr.vmem [resolvable:$false] %s1115_s2 }
  0x84   : > { %s1117_s3 = scalar_lea.vmem %s1116_s2, 512  ;;  %p1118_p0 = scmp.lt.s32.totalorder %s266_s8, %s1116_s2 }
  0x85   : > { %p1113_p1 = pnand %p1111_p2, %p1097_p7  ;;  %p1119_p10 = scmp.lt.s32.totalorder %s1117_s3, %s1110_s24 }
  0x87   : > { %p1114_p9 = pneg %p1113_p1  ;;  %p1120_p3 = por %p1119_p10, %p1118_p0 }
  0x89   : > { %p1121_p6 = pnand %p1120_p3, %p1114_p9 }
  0x8b   : > { %1124 = shalt.err (!%p1121_p6)
}
  0x8c   : > { %863 = dma.hbm_to_vmem [thread:$0]  (!%p1578_p11), %s1574_s1, 256, %s266_s8, %s1437_s4  }
  0x8d   : > { %p1807_p4 = scmp.ne.s32.totalorder %s1791_s25, 0 }
  0x8e   : > { %s276_s0 = sand.u32 (!%p1807_p4), 1, %s1255_s22   ;;  %p1808_p2 = scmp.ne.s32.totalorder (!%p1807_p4), %s1793_s6, 0 }
  0x8f   : > { %274 = sbr.rel (%p1807_p4) target bundleno = 473 (0x1d9), region = 36  ;;  %s1607_s27 = sshll.u32 (!%p1807_p4), %s276_s0, 3 }
  0x90   : > { %s277_s9 = scalar_lea.sflag (!%p1807_p4), [#allocation3], %s276_s0  ;;  %s280_s13 = scalar_lea.vmem (!%p1807_p4), [#allocation2], %s1607_s27 }
  0x96   : > { %1210 = dma.done.wait (%p1808_p2), %s277_s9, 128  }
  0x97   : > { %1212 = vsyncadd (%p1808_p2), %s277_s9, 4294967168  ;;  %s285_s4 = sand.u32 1, %s1472_s7   ;;  %s287_s1 = sand.u32 1, %s1243_s19  }
  0x98   : > { %s798_s25 = sshll.u32 %s287_s1, 8  ;;  %s286_s15 = scalar_lea.sflag [#allocation6], %s285_s4 }
  0x99   : > { %s1616_s8 = scalar_lea.vmem [#allocation5], %s798_s25  ;;  %p1809_p10 = scmp.ne.s32.totalorder %s1795_s21, 0 }
  0x9b   : > { %1214 = dma.done.wait (%p1809_p10), %s286_s15, 4096  }
  0x9c   : > { %1216 = vsyncadd (%p1809_p10), %s286_s15, 4294963200  ;;  %s296_s24 = sand.u32 1, %s1231_s16   ;;  %p1810_p0 = scmp.ne.s32.totalorder %s1801_s30, 0 }
  0x9d   : > { %s799_s6 = sshll.u32 %s296_s24, 4 }
  0x9e   : > { %s298_s18 = scalar_lea.vmem [#allocation7], %s799_s6 }
  0x9f   : > { %1218 = dma.done.wait (%p1810_p0), %s286_s15, 256  }
  0xa0   : > { %1220 = vsyncadd (%p1810_p0), %s286_s15, 4294967040  ;;  %s1811_s7 = sld [smem:[#allocation15_spill]]  ;;  %s1633_s4 = scalar_lea.vmem [#allocation8], %s799_s6 }
  0xa1   : > { %s1812_s21 = sld [smem:[#allocation21_spill]]  ;;  %s1813_s1 = sld [smem:[#allocation14_spill]] }
  0xa6   : > { %s801_s2 = sshll.u32 %s1811_s7, 1 }
  0xa7   : > { %p341_p11 = scmp.lt.s32.totalorder %s801_s2, 3  ;;  %p802_p7 = scmp.ne.s32.totalorder %s1813_s1, 0 }
  0xa8   : > { %v355_v0 = vlaneseq (!%p802_p7)  ;;  %v351_v5 = vld [vmem:[%s298_s18] sm:$0xff] (!%p802_p7)  ;;  %v352_v6 = vld [vmem:[%s298_s18 + $0x8] sm:$0xff] (!%p802_p7) }
  0xa9   : > { %s1841_s2 = smov (!%p341_p11, %s801_s2), 3  ;;  %350 = sbr.rel (%p802_p7) target bundleno = 179 (0xb3), region = 52 }
  0xaa   : > { %s343_s9 = scalar_lea.vmem %s1812_s21, %s1841_s2  ;;  %v356_v1 = vshrl.u32 (!%p802_p7), %v355_v0, 7 }
  0xab   : > { %v353_v2 = vld [vmem:[%s343_s9] sm:$0x3] (!%p802_p7) }
  0xac   : > { %v357_v3 = vsub.s32 (!%p802_p7), 0, %v356_v1  ;;  %v361_v4 = vsub.s32 (!%p802_p7), 1, %v356_v1 }
  0xae   : > { %v358_v7 = vrot.slane (!%p802_p7), %v353_v2, %v357_v3  ;;  %v362_v8 = vrot.slane (!%p802_p7), %v353_v2, %v361_v4 }
  0xb0   : > { %v365_v9 = vadd.f32 %v358_v7, %v351_v5  ;;  %v366_v10 = vadd.f32 %v362_v8, %v352_v6 }
  0xb2   : > { %367 = vst [vmem:[%s1633_s4] sm:$0xff] %v365_v9  ;;  %368 = vst [vmem:[%s1633_s4 + $0x8] sm:$0xff] %v366_v10 }
  0xb3 PF: > { %v985_v11 = vld [vmem:[%s1616_s8 + $0x4] ss:$8 sps:$4 sm:$0xff]   ;;  %v987_v12 = vld [vmem:[%s1616_s8] ss:$8 sps:$4 sm:$0xff]   ;;  %v988_v13 = vld [vmem:[%s1616_s8 + $0x14] ss:$8 sps:$4 sm:$0xff]  }
  0xb4   : > { %571 = vmatprep.subr.bf16.mxu0 %v985_v11  ;;  %v990_v14 = vld [vmem:[%s1616_s8 + $0x10] ss:$8 sps:$4 sm:$0xff]   ;;  %v991_v15 = vld [vmem:[%s1616_s8 + $0x24] ss:$8 sps:$4 sm:$0xff]   ;;  %v993_v16 = vld [vmem:[%s1616_s8 + $0x20] ss:$8 sps:$4 sm:$0xff]  }
  0xb5   : > { %572 = vmatpush1.bf16.msra.mxu0 %v987_v12  ;;  %v994_v17 = vld [vmem:[%s1616_s8 + $0x34] ss:$8 sps:$4 sm:$0xff]   ;;  %v996_v18 = vld [vmem:[%s1616_s8 + $0x30] ss:$8 sps:$4 sm:$0xff]   ;;  %v997_v19 = vld [vmem:[%s1616_s8 + $0x44] ss:$8 sps:$4 sm:$0xff]  }
  0xb6   : > { %573 = vmatprep.subr.bf16.mxu0 %v988_v13  ;;  %v999_v20 = vld [vmem:[%s1616_s8 + $0x40] ss:$8 sps:$4 sm:$0xff]   ;;  %v1000_v21 = vld [vmem:[%s1616_s8 + $0x54] ss:$8 sps:$4 sm:$0xff]   ;;  %v1002_v22 = vld [vmem:[%s1616_s8 + $0x50] ss:$8 sps:$4 sm:$0xff]  }
  0xb7   : > { %v1003_v23 = vld [vmem:[%s1616_s8 + $0x64] ss:$8 sps:$4 sm:$0xff]   ;;  %v371_v24 = vld [vmem:[%s280_s13] sm:$0xff]  ;;  %v1005_v26 = vld [vmem:[%s1616_s8 + $0x60] ss:$8 sps:$4 sm:$0xff]   ;;  %s1814_s30 = sld [smem:[#allocation15_spill]] }
  0xb8   : > { %v804_v25 = vcombine.high %v371_v24, %v371_v24  ;;  %v1006_v27 = vld [vmem:[%s1616_s8 + $0x74] ss:$8 sps:$4 sm:$0xff]   ;;  %v1008_v28 = vld [vmem:[%s1616_s8 + $0x70] ss:$8 sps:$4 sm:$0xff]   ;;  %v1009_v29 = vld [vmem:[%s1616_s8 + $0x84] ss:$8 sps:$4 sm:$0xff]   ;;  %v803_v45 = vcombine.low %v371_v24, %v371_v24 }
  0xb9   : > { %574 = vmatpush1.bf16.msra.mxu0 %v990_v14  ;;  %v1011_v30 = vld [vmem:[%s1616_s8 + $0x80] ss:$8 sps:$4 sm:$0xff]   ;;  %v1012_v31 = vld [vmem:[%s1616_s8 + $0x94] ss:$8 sps:$4 sm:$0xff]   ;;  %v1014_v32 = vld [vmem:[%s1616_s8 + $0x90] ss:$8 sps:$4 sm:$0xff]  }
  0xba   : > { %575 = vmatprep.subr.bf16.mxu0 %v991_v15  ;;  %603 = vmatprep.mubr.bf16.mxu0 %v804_v25  ;;  %v1015_v33 = vld [vmem:[%s1616_s8 + $0xa4] ss:$8 sps:$4 sm:$0xff]   ;;  %v1017_v34 = vld [vmem:[%s1616_s8 + $0xa0] ss:$8 sps:$4 sm:$0xff]   ;;  %v1018_v35 = vld [vmem:[%s1616_s8 + $0xb4] ss:$8 sps:$4 sm:$0xff]  }
  0xbb   : > { %v1020_v36 = vld [vmem:[%s1616_s8 + $0xb0] ss:$8 sps:$4 sm:$0xff]   ;;  %v1021_v37 = vld [vmem:[%s1616_s8 + $0xc4] ss:$8 sps:$4 sm:$0xff]   ;;  %v1023_v38 = vld [vmem:[%s1616_s8 + $0xc0] ss:$8 sps:$4 sm:$0xff]  }
  0xbc   : > { %v1024_v39 = vld [vmem:[%s1616_s8 + $0xd4] ss:$8 sps:$4 sm:$0xff]   ;;  %v1026_v40 = vld [vmem:[%s1616_s8 + $0xd0] ss:$8 sps:$4 sm:$0xff]   ;;  %v1027_v41 = vld [vmem:[%s1616_s8 + $0xe4] ss:$8 sps:$4 sm:$0xff]  }
  0xbd   : > { %576 = vmatpush1.bf16.msra.mxu0 %v993_v16  ;;  %v1029_v42 = vld [vmem:[%s1616_s8 + $0xe0] ss:$8 sps:$4 sm:$0xff]   ;;  %v1030_v43 = vld [vmem:[%s1616_s8 + $0xf4] ss:$8 sps:$4 sm:$0xff]   ;;  %v1032_v44 = vld [vmem:[%s1616_s8 + $0xf0] ss:$8 sps:$4 sm:$0xff]  }
  0xbe   : > { %577 = vmatprep.subr.bf16.mxu0 %v994_v17  ;;  %v369_v46 = vld [vmem:[%s1633_s4] sm:$0xff]  ;;  %v370_v47 = vld [vmem:[%s1633_s4 + $0x8] sm:$0xff]  ;;  %s845_s27 = sshll.u32 %s1814_s30, 8  ;;  %s633_s13 = sshll.u32 %s1633_s4, 4  ;;  %s1681_s13 = int_to_ptr.vmem [resolvable:$true] %s633_s13 }
  0xbf   : > { %s1815_s8 = sld [smem:[#allocation23_spill]]  ;;  %s617_s18 = scalar_lea.sflag [#allocation4], %s296_s24 }
  0xc0   : > { %s1125_s7 = scalar_lea.vmem %s1681_s13, 256  ;;  %p1816_p5 = scmp.ne.s32.totalorder %s1802_s12, 0 }
  0xc1   : > { %578 = vmatpush1.bf16.msra.mxu0 %v996_v18  ;;  %p1126_p13 = scmp.ne.s32.totalorder %s1681_s13, %s1125_s7  ;;  %s1287_s2 = smov [#allocation8]  }
  0xc2   : > { %579 = vmatprep.subr.bf16.mxu0 %v997_v19  ;;  %s1129_s3 = sshll.u32 %s1287_s2, 4  ;;  %s1130_s3 = int_to_ptr.vmem [resolvable:$false] %s1129_s3 }
  0xc3   : > { %p1127_p12 = pnand %p1126_p13, %p1816_p5  ;;  %s1131_s0 = scalar_lea.vmem %s1130_s3, 512 }
  0xc4   : > { %p1132_p1 = scmp.lt.s32.totalorder %s1681_s13, %s1130_s3  ;;  %p1133_p9 = scmp.lt.s32.totalorder %s1131_s0, %s1125_s7 }
  0xc5   : > { %580 = vmatpush1.bf16.msra.mxu0 %v999_v20  ;;  %s1679_s6 = scalar_lea.hbm %s1815_s8, %s845_s27  ;;  %p1128_p8 = pneg %p1127_p12 }
  0xc6   : > { %581 = vmatprep.subr.bf16.mxu0 %v1000_v21  ;;  %p1134_p3 = por %p1133_p9, %p1132_p1 }
  0xc8   : > { %p1135_p6 = pnand %p1134_p3, %p1128_p8 }
  0xc9   : > { %582 = vmatpush1.bf16.msra.mxu0 %v1002_v22 }
  0xca   : > { %583 = vmatprep.subr.bf16.mxu0 %v1003_v23 }
  0xcd   : > { %584 = vmatpush1.bf16.msra.mxu0 %v1005_v26 }
  0xce   : > { %585 = vmatprep.subr.bf16.mxu0 %v1006_v27 }
  0xd1   : > { %586 = vmatpush1.bf16.msra.mxu0 %v1008_v28 }
  0xd2   : > { %587 = vmatprep.subr.bf16.mxu0 %v1009_v29 }
  0xd5   : > { %588 = vmatpush1.bf16.msra.mxu0 %v1011_v30 }
  0xd6   : > { %589 = vmatprep.subr.bf16.mxu0 %v1012_v31 }
  0xd9   : > { %590 = vmatpush1.bf16.msra.mxu0 %v1014_v32 }
  0xda   : > { %591 = vmatprep.subr.bf16.mxu0 %v1015_v33 }
  0xdd   : > { %592 = vmatpush1.bf16.msra.mxu0 %v1017_v34 }
  0xde   : > { %593 = vmatprep.subr.bf16.mxu0 %v1018_v35 }
  0xe1   : > { %594 = vmatpush1.bf16.msra.mxu0 %v1020_v36 }
  0xe2   : > { %595 = vmatprep.subr.bf16.mxu0 %v1021_v37 }
  0xe5   : > { %596 = vmatpush1.bf16.msra.mxu0 %v1023_v38 }
  0xe6   : > { %597 = vmatprep.subr.bf16.mxu0 %v1024_v39 }
  0xe9   : > { %598 = vmatpush1.bf16.msra.mxu0 %v1026_v40 }
  0xea   : > { %599 = vmatprep.subr.bf16.mxu0 %v1027_v41 }
  0xed   : > { %600 = vmatpush1.bf16.msra.mxu0 %v1029_v42 }
  0xee   : > { %601 = vmatprep.subr.bf16.mxu0 %v1030_v43 }
  0xf1   : > { %602 = vmatpush1.bf16.msra.mxu0 %v1032_v44 }
  0xf4   : > { %604 = vmatmul.mubr.bf16.vlgmr.msra.gmra.mrb[0].mxu0 %v803_v45 }
 0x1c7   : > { %v605_v48 = vpop.f32.mrb[0].mxu0 }
 0x1c8   : > { %v612_v49 = vadd.f32 %v605_v48, %v369_v46  ;;  %v607_v50 = vpop.f32.mrb[1].mxu0 }
 0x1c9   : > { %v613_v51 = vadd.f32 %v607_v50, %v370_v47  ;;  %v609_v52 = vpop.f32.mrb[2].mxu0 }
 0x1ca   : > { %614 = vst [vmem:[%s1633_s4] sm:$0xff] %v612_v49  ;;  %v610_v53 = vpop.f32.mrb[3].mxu0 }
 0x1cb   : > { %615 = vst [vmem:[%s1633_s4 + $0x8] sm:$0xff] %v613_v51 }
 0x1cc   : > { %1138 = shalt.err (!%p1135_p6)
}
 0x1cd   : > { %s1139_s24 = scalar_lea.hbm %s1679_s6, 256  ;;  %s1143_s4 = scalar_lea.hbm %s1815_s8, 512 }
 0x1ce   : > { %p1140_p4 = scmp.ne.s32.totalorder %s1679_s6, %s1139_s24  ;;  %p1144_p0 = scmp.lt.u32.totalorder %s1679_s6, %s1815_s8 }
 0x1cf   : > { %p1145_p11 = scmp.lt.u32.totalorder %s1143_s4, %s1139_s24  ;;  %p1147_p13 = scmp.lt.u32.totalorder %s1139_s24, %s1679_s6 }
 0x1d0   : > { %p1141_p2 = pnand %p1140_p4, %p1816_p5 }
 0x1d1   : > { %p1146_p7 = por %p1145_p11, %p1144_p0 }
 0x1d2   : > { %p1142_p10 = pneg %p1141_p2 }
 0x1d3   : > { %p1148_p12 = por %p1147_p13, %p1146_p7 }
 0x1d5   : > { %p1149_p8 = pnand %p1148_p12, %p1142_p10 }
 0x1d7   : > { %1152 = shalt.err (!%p1149_p8)
}
 0x1d8   : > { %852 = dma.vmem_to_hbm [thread:$0]  (%p1816_p5), %s1681_s13, 256, %s1679_s6, %s617_s18  }
 0x1d9 PF: > { %s1817_s27 = sld [smem:[#allocation13_spill]]  ;;  %p869_p1 = scmp.ge.s32.totalorder %s1279_s28, 2 }
 0x1da   : > { %p1818_p9 = scmp.ne.s32.totalorder %s1803_s10, 0 }
 0x1dc   : > { %p865_p3 = pnand %p869_p1, %p1818_p9 }
 0x1df   : > { %s645_s25 = sand.u32 1, %s1817_s27  }
 0x1e0   : > { %s646_s15 = scalar_lea.sflag [#allocation4], %s645_s25 }
 0x1e1   : > { %1222 = dma.done.wait (!%p865_p3), %s646_s15, 256  }
 0x1e2   : > { %1224 = vsyncadd (!%p865_p3), %s646_s15, 4294967040  ;;  %s23_s28 = sadd.s32 1, %s1279_s28   ;;  %s1820_s25 = sld [smem:[#allocation16_spill]] }
 0x1e3   : > { %p1713_p6 = scmp.ge.s32.totalorder %s23_s28, 6   ;;  %s1821_s12 = sld [smem:[#allocation17_spill]] }
 0x1e4   : > { %s1822_s27 = sld [smem:[#allocation18_spill]]  ;;  %s1823_s15 = smov %s1231_s16 }
 0x1e5   : > { %s1824_s16 = smov %s1235_s17  ;;  %s1825_s17 = smov %s1550_s11 }
 0x1e6   : > { %s1826_s18 = smov %s1243_s19  ;;  %s1827_s19 = smov %s1247_s20 }
 0x1e7   : > { %s1828_s20 = smov %s1418_s29  ;;  %s1829_s21 = smov %s1255_s22 }
 0x1e8   : > { %s1830_s22 = smov %s1259_s23  ;;  %s1831_s23 = smov %s1481_s5 }
 0x1e9   : > { %s1832_s24 = smov %s1271_s26  ;;  %s1833_s26 = smov %s1821_s12 }
 0x1ea   :  { %22 = sbr.rel (!%p1713_p6) target bundleno = 18 (0x12), region = 112 }
 0x1f1   :  { %651 = vsyncpa [#allocation3], 1 }
 0x1f2   :  { %653 = vsyncpa [#allocation3 + $0x1], 1 }
 0x1f3   :  { %654 = vsyncpa [#allocation6], 1 }
 0x1f4   :  { %656 = vsyncpa [#allocation6 + $0x1], 1 }
 0x1f5   :  { %657 = vsyncpa [#allocation4], 1 }
 0x1f6   :  { %659 = vsyncpa [#allocation4 + $0x1], 1 }

</bundles_post_ra>
